<compile_context>
chip_gen: v5e
topology: v5e:2x2
jax: 0.10.0
libtpu: 0.0.40
codegen_flags: <defaults>
</compile_context>

<pallas_src>
import numpy as np
import jax
import jax.numpy as jnp
from jax.experimental import pallas as pl
from jax.experimental.pallas import tpu as pltpu

# ----------------------------- config (small, consistent with module) -------
HIDDEN = 40                       # hidden_size (divisible by 5)
SUB = HIDDEN // 5                 # 8, per-embedding width
TYPE_VOCAB = 8
AGE_VOCAB = 120
TIME_VOCAB = 367
MAX_POS = 64
LN_EPS = 1e-5                     # PyTorch nn.LayerNorm default
TOK_TILE_MAX = 4096               # tokens per grid step (becomes the lane axis in-kernel)


def _round_up(x, m):
    return ((x + m - 1) // m) * m


def _gelu(x):
    # tanh-approximate GELU: the transcendental runs on the EUP slot instead of a
    # long VALU erf polynomial (perf review). Slightly differs from exact-erf nn.GELU().
    return jax.nn.gelu(x, approximate=True)


# ----------------------------- kernel ----------------------------------------
def bert_emb_kernel(x_ref, pv_ref, pw_ref, o_ref):
    # x_ref / o_ref: (tt, H) row-blocks of the natural [T, H] activation.
    # pv_ref: (4, H, 1)  packed [b1' (LN1 affine folded), b2, ln2_g, ln2_b]
    # pw_ref: (2, H, H)  packed [W1' (LN1 affine folded), W2] in nn.Linear (out, in) layout
    x = x_ref[...].T              # (H, tt): tokens lane-dense, H on sublanes (XLU transpose)

    b1 = pv_ref[0]                # (H, 1), broadcast over token lanes
    b2 = pv_ref[1]
    ln2_g = pv_ref[2]
    ln2_b = pv_ref[3]
    w1 = pw_ref[0]                # (H, H)
    w2 = pw_ref[1]

    def normalize(v):
        # reduce over H (sublane axis); biased variance like PyTorch.
        # NB: any block-boundary padding columns stay finite thanks to LN_EPS > 0 and
        # are column-independent everywhere below, so their garbage never leaks.
        mu = jnp.mean(v, axis=0, keepdims=True)              # (1, tt)
        d = v - mu
        var = jnp.mean(d * d, axis=0, keepdims=True)
        return d * jax.lax.rsqrt(var + LN_EPS)

    # seq_layers[0..1]: LayerNorm(H) (affine folded into W1'/b1') ; Dropout -> identity (eval)
    h = normalize(x)
    # seq_layers[2..3]: Linear(H,H) + GELU   ( (x @ W^T)^T == W @ x^T )
    h = jnp.dot(w1, h, preferred_element_type=jnp.float32,
                precision=jax.lax.Precision.HIGHEST) + b1
    h = _gelu(h)
    # seq_layers[4..5]: Linear(H,H) + GELU
    h = jnp.dot(w2, h, preferred_element_type=jnp.float32,
                precision=jax.lax.Precision.HIGHEST) + b2
    h = _gelu(h)
    # final self.LayerNorm (with affine)
    h = normalize(h) * ln2_g + ln2_b
    o_ref[...] = h.T.astype(o_ref.dtype)                     # transpose back on XLU


def _pick_token_tile(T):
    """Token-tile size and grid length for a [T, H] activation."""
    if T < 256:
        # single full-extent block (block == array extent is always legal)
        return T, 1
    # >= 2 grid steps so dimension_semantics=("parallel",) can shard across the two
    # v7x TensorCores; tile is a multiple of 128 so the in-kernel transposed layout
    # (H, tt) is lane-dense.
    n_tiles = max(2, pl.cdiv(T, TOK_TILE_MAX))
    tt = _round_up(pl.cdiv(T, n_tiles), 128)
    return tt, pl.cdiv(T, tt)


def run_token_mlp(x, pvec, pw):
    """x: [T, H] tokens in natural (row) layout. Returns [T, H]."""
    T, H = x.shape
    tt, grid = _pick_token_tile(T)

    return pl.pallas_call(
        bert_emb_kernel,
        out_shape=jax.ShapeDtypeStruct((T, H), jnp.float32),
        grid=(grid,),
        in_specs=[
            pl.BlockSpec((tt, H), lambda i: (i, 0)),        # token row-block
            pl.BlockSpec((4, H, 1), lambda i: (0, 0, 0)),   # packed vectors
            pl.BlockSpec((2, H, H), lambda i: (0, 0, 0)),   # packed weights
        ],
        out_specs=pl.BlockSpec((tt, H), lambda i: (i, 0)),
        compiler_params=pltpu.CompilerParams(
            dimension_semantics=("parallel",)),
    )(x, pvec, pw)


# ----------------------------- parameter init --------------------------------
def init_posi_embedding(max_position_embedding, hidden_size):
    # exact replica of BertEmbeddings._init_posi_embedding
    table = np.zeros((max_position_embedding, hidden_size), dtype=np.float32)
    for pos in range(max_position_embedding):
        for idx in np.arange(0, hidden_size, step=2):
            table[pos, idx] = np.sin(pos / 10000 ** (2 * idx / hidden_size))
    for pos in range(max_position_embedding):
        for idx in np.arange(1, hidden_size, step=2):
            table[pos, idx] = np.cos(pos / 10000 ** (2 * idx / hidden_size))
    return jnp.asarray(table)


def init_params(key):
    ks = jax.random.split(key, 6)
    H = HIDDEN
    type_tab = jax.random.normal(ks[0], (TYPE_VOCAB, SUB), jnp.float32)
    type_tab = type_tab.at[0].set(0.0)                      # padding_idx=0

    ln1_g = jnp.ones((H,), jnp.float32)
    ln1_b = jnp.zeros((H,), jnp.float32)
    ln2_g = jnp.ones((H,), jnp.float32)
    ln2_b = jnp.zeros((H,), jnp.float32)
    b1 = jax.random.normal(ks[2], (H,), jnp.float32) * 0.05
    b2 = jax.random.normal(ks[3], (H,), jnp.float32) * 0.05
    # nn.Linear native layout (out_features, in_features) -- consumed as W @ x^T
    w1 = jax.random.normal(ks[4], (H, H), jnp.float32) * 0.05
    w2 = jax.random.normal(ks[5], (H, H), jnp.float32) * 0.05

    # Fold LayerNorm-1's affine into Linear-1 (exact; zero numerics change):
    #   W1 @ (norm(x) * g + b) + b1  ==  (W1 * g[cols]) @ norm(x) + (W1 @ b + b1)
    w1_f = w1 * ln1_g[None, :]
    b1_f = w1 @ ln1_b + b1

    return {
        "type_table": type_tab,
        "age_table": init_posi_embedding(AGE_VOCAB, SUB),
        "time_table": init_posi_embedding(TIME_VOCAB, SUB),
        "posi_table": init_posi_embedding(MAX_POS, SUB),
        "cls_token": jax.random.normal(ks[1], (1, 1, H), jnp.float32),
        # packed per-channel vectors: [b1', b2, ln2_g, ln2_b]
        "pvec": jnp.stack([b1_f, b2, ln2_g, ln2_b]).reshape(4, H, 1),
        # packed weights: [W1', W2]
        "pw": jnp.stack([w1_f, w2]),
        # kept for the pure-JAX reference check
        "_ref": {"ln1_g": ln1_g, "ln1_b": ln1_b, "w1": w1, "b1": b1,
                 "w2": w2, "b2": b2, "ln2_g": ln2_g, "ln2_b": ln2_b},
    }


# ----------------------------- full forward -----------------------------------
def bert_embeddings_forward(word_embed, age_ids, time_ids, type_ids, posi_ids, params):
    # embedding lookups (glue)
    type_e = jnp.take(params["type_table"], type_ids, axis=0)     # [B, N, SUB]
    age_e = jnp.take(params["age_table"], age_ids, axis=0)
    time_e = jnp.take(params["time_table"], time_ids, axis=0)
    posi_e = jnp.take(params["posi_table"], posi_ids, axis=0)

    word_e = jnp.reshape(word_embed, type_e.shape)                # [B, N, SUB]
    # torch.cat((word, type, posi, age, time), dim=2)
    emb = jnp.concatenate([word_e, type_e, posi_e, age_e, time_e], axis=2)  # [B, N, H]

    b, n, H = emb.shape
    cls = jnp.broadcast_to(params["cls_token"], (b, 1, H))
    emb = jnp.concatenate([cls, emb], axis=1)                     # [B, N+1, H]

    x = emb.reshape(b * (n + 1), H)                               # [T, H], no transpose
    out = run_token_mlp(x, params["pvec"], params["pw"])          # Pallas hot path
    return out.reshape(b, n + 1, H)


# ----------------------------- pure-JAX reference (for a sanity check) --------
def _reference_token_mlp(x, p):
    def ln(v, g, b):
        mu = jnp.mean(v, axis=-1, keepdims=True)
        var = jnp.mean((v - mu) ** 2, axis=-1, keepdims=True)
        return (v - mu) * jax.lax.rsqrt(var + LN_EPS) * g + b
    h = ln(x, p["ln1_g"], p["ln1_b"])
    h = jnp.dot(h, p["w1"].T, precision=jax.lax.Precision.HIGHEST) + p["b1"]
    h = _gelu(h)
    h = jnp.dot(h, p["w2"].T, precision=jax.lax.Precision.HIGHEST) + p["b2"]
    h = _gelu(h)
    return ln(h, p["ln2_g"], p["ln2_b"])


if __name__ == "__main__":
    key = jax.random.PRNGKey(0)
    kp, kw, ki = jax.random.split(key, 3)
    params = init_params(kp)

    B, N = 2, 15            # T = B*(N+1) = 32 tokens through the Pallas hot path
    # synthetic stand-in for GraphTransformer output (see TODO(synk) above)
    word_embed = jax.random.normal(kw, (B, N, SUB), jnp.float32)

    k1, k2, k3, k4 = jax.random.split(ki, 4)
    age_ids = jax.random.randint(k1, (B, N), 0, AGE_VOCAB)
    time_ids = jax.random.randint(k2, (B, N), 0, TIME_VOCAB)
    type_ids = jax.random.randint(k3, (B, N), 0, TYPE_VOCAB)
    posi_ids = jax.random.randint(k4, (B, N), 0, MAX_POS)

    out = bert_embeddings_forward(word_embed, age_ids, time_ids, type_ids, posi_ids, params)
    out = jax.block_until_ready(out)
    assert out.shape == (B, N + 1, HIDDEN)
    assert bool(jnp.all(jnp.isfinite(out)))

    # correctness sanity check against a pure-JAX reference of the same math
    type_e = jnp.take(params["type_table"], type_ids, axis=0)
    age_e = jnp.take(params["age_table"], age_ids, axis=0)
    time_e = jnp.take(params["time_table"], time_ids, axis=0)
    posi_e = jnp.take(params["posi_table"], posi_ids, axis=0)
    emb = jnp.concatenate([word_embed.reshape(type_e.shape), type_e, posi_e, age_e, time_e], axis=2)
    emb = jnp.concatenate([jnp.broadcast_to(params["cls_token"], (B, 1, HIDDEN)), emb], axis=1)
    ref = _reference_token_mlp(emb, params["_ref"])
    assert bool(jnp.max(jnp.abs(out - ref)) < 5e-3)

    print("KERNEL_OK")
</pallas_src>

<mosaic_0001>
module attributes {stable_mosaic.version = 11 : i64} {
  func.func @bert_emb_kernel(%arg0: i32, %arg1: memref<32x40xf32, #tpu.memory_space<vmem>>, %arg2: memref<4x40x1xf32, #tpu.memory_space<vmem>>, %arg3: memref<2x40x40xf32, #tpu.memory_space<vmem>>, %arg4: memref<32x40xf32, #tpu.memory_space<vmem>>) attributes {dimension_semantics = [#tpu.dimension_semantics<parallel>], iteration_bounds = array<i64: 1>, scalar_prefetch = 0 : i64, scratch_operands = 0 : i64, tpu.core_type = #tpu.core_type<tc>, window_params = [{transform_indices = @transform_0, window_bounds = array<i64: 32, 40>}, {pipeline_mode = #tpu.pipeline_mode<synchronous>, transform_indices = @transform_1, window_bounds = array<i64: 4, 40, 1>}, {pipeline_mode = #tpu.pipeline_mode<synchronous>, transform_indices = @transform_2, window_bounds = array<i64: 2, 40, 40>}, {transform_indices = @transform_3, window_bounds = array<i64: 32, 40>}]} {
    %c0 = arith.constant 0 : index
    %c0_0 = arith.constant 0 : index
    %0 = vector.load %arg1[%c0, %c0_0] : memref<32x40xf32, #tpu.memory_space<vmem>>, vector<32x40xf32>
    %1 = tpu.transpose %0, [1, 0] : vector<32x40xf32> -> vector<40x32xf32>
    %c0_1 = arith.constant 0 : index
    %c0_2 = arith.constant 0 : index
    %c0_3 = arith.constant 0 : index
    %2 = vector.load %arg2[%c0_1, %c0_2, %c0_3] : memref<4x40x1xf32, #tpu.memory_space<vmem>>, vector<1x40x1xf32>
    %3 = vector.shape_cast %2 : vector<1x40x1xf32> to vector<40x1xf32>
    %c1 = arith.constant 1 : index
    %c0_4 = arith.constant 0 : index
    %c0_5 = arith.constant 0 : index
    %4 = vector.load %arg2[%c1, %c0_4, %c0_5] : memref<4x40x1xf32, #tpu.memory_space<vmem>>, vector<1x40x1xf32>
    %5 = vector.shape_cast %4 : vector<1x40x1xf32> to vector<40x1xf32>
    %c2 = arith.constant 2 : index
    %c0_6 = arith.constant 0 : index
    %c0_7 = arith.constant 0 : index
    %6 = vector.load %arg2[%c2, %c0_6, %c0_7] : memref<4x40x1xf32, #tpu.memory_space<vmem>>, vector<1x40x1xf32>
    %7 = vector.shape_cast %6 : vector<1x40x1xf32> to vector<40x1xf32>
    %c3 = arith.constant 3 : index
    %c0_8 = arith.constant 0 : index
    %c0_9 = arith.constant 0 : index
    %8 = vector.load %arg2[%c3, %c0_8, %c0_9] : memref<4x40x1xf32, #tpu.memory_space<vmem>>, vector<1x40x1xf32>
    %9 = vector.shape_cast %8 : vector<1x40x1xf32> to vector<40x1xf32>
    %c0_10 = arith.constant 0 : index
    %c0_11 = arith.constant 0 : index
    %c0_12 = arith.constant 0 : index
    %10 = vector.load %arg3[%c0_10, %c0_11, %c0_12] : memref<2x40x40xf32, #tpu.memory_space<vmem>>, vector<1x40x40xf32>
    %11 = vector.shape_cast %10 : vector<1x40x40xf32> to vector<40x40xf32>
    %c1_13 = arith.constant 1 : index
    %c0_14 = arith.constant 0 : index
    %c0_15 = arith.constant 0 : index
    %12 = vector.load %arg3[%c1_13, %c0_14, %c0_15] : memref<2x40x40xf32, #tpu.memory_space<vmem>>, vector<1x40x40xf32>
    %13 = vector.shape_cast %12 : vector<1x40x40xf32> to vector<40x40xf32>
    %cst = arith.constant dense<0.000000e+00> : vector<32xf32>
    %14 = vector.multi_reduction <add>, %1, %cst [0] : vector<40x32xf32> to vector<32xf32>
    %15 = vector.shape_cast %14 : vector<32xf32> to vector<1x32xf32>
    %cst_16 = arith.constant 4.000000e+01 : f32
    %16 = vector.broadcast %cst_16 : f32 to vector<1x32xf32>
    %17 = arith.divf %15, %16 : vector<1x32xf32>
    %18 = vector.broadcast %17 : vector<1x32xf32> to vector<40x32xf32>
    %19 = arith.subf %1, %18 : vector<40x32xf32>
    %20 = arith.mulf %19, %19 : vector<40x32xf32>
    %cst_17 = arith.constant dense<0.000000e+00> : vector<32xf32>
    %21 = vector.multi_reduction <add>, %20, %cst_17 [0] : vector<40x32xf32> to vector<32xf32>
    %22 = vector.shape_cast %21 : vector<32xf32> to vector<1x32xf32>
    %cst_18 = arith.constant 4.000000e+01 : f32
    %23 = vector.broadcast %cst_18 : f32 to vector<1x32xf32>
    %24 = arith.divf %22, %23 : vector<1x32xf32>
    %cst_19 = arith.constant 9.99999974E-6 : f32
    %25 = vector.broadcast %cst_19 : f32 to vector<1x32xf32>
    %26 = arith.addf %24, %25 : vector<1x32xf32>
    %27 = math.rsqrt %26 : vector<1x32xf32>
    %28 = vector.broadcast %27 : vector<1x32xf32> to vector<40x32xf32>
    %29 = arith.mulf %19, %28 : vector<40x32xf32>
    %cst_20 = arith.constant dense<0.000000e+00> : vector<40x32xf32>
    %30 = tpu.matmul %11, %29, %cst_20 {dimension_numbers = #tpu.dot_dimension_numbers<[1], [0], [0], [1], [0, 0, 1, 1], [], []>, precision = #tpu.contract_precision<fp32>} : vector<40x40xf32>, vector<40x32xf32>, vector<40x32xf32> -> vector<40x32xf32>
    %31 = vector.broadcast %3 : vector<40x1xf32> to vector<40x32xf32>
    %32 = arith.addf %30, %31 : vector<40x32xf32>
    %33 = arith.mulf %32, %32 : vector<40x32xf32>
    %34 = arith.mulf %32, %33 : vector<40x32xf32>
    %cst_21 = arith.constant 4.471500e-02 : f32
    %35 = vector.broadcast %cst_21 : f32 to vector<40x32xf32>
    %36 = arith.mulf %35, %34 : vector<40x32xf32>
    %37 = arith.addf %32, %36 : vector<40x32xf32>
    %cst_22 = arith.constant 0.797884583 : f32
    %38 = vector.broadcast %cst_22 : f32 to vector<40x32xf32>
    %39 = arith.mulf %38, %37 : vector<40x32xf32>
    %40 = math.tanh %39 : vector<40x32xf32>
    %cst_23 = arith.constant 1.000000e+00 : f32
    %41 = vector.broadcast %cst_23 : f32 to vector<40x32xf32>
    %42 = arith.addf %41, %40 : vector<40x32xf32>
    %cst_24 = arith.constant 5.000000e-01 : f32
    %43 = vector.broadcast %cst_24 : f32 to vector<40x32xf32>
    %44 = arith.mulf %43, %42 : vector<40x32xf32>
    %45 = arith.mulf %32, %44 : vector<40x32xf32>
    %cst_25 = arith.constant dense<0.000000e+00> : vector<40x32xf32>
    %46 = tpu.matmul %13, %45, %cst_25 {dimension_numbers = #tpu.dot_dimension_numbers<[1], [0], [0], [1], [0, 0, 1, 1], [], []>, precision = #tpu.contract_precision<fp32>} : vector<40x40xf32>, vector<40x32xf32>, vector<40x32xf32> -> vector<40x32xf32>
    %47 = vector.broadcast %5 : vector<40x1xf32> to vector<40x32xf32>
    %48 = arith.addf %46, %47 : vector<40x32xf32>
    %49 = arith.mulf %48, %48 : vector<40x32xf32>
    %50 = arith.mulf %48, %49 : vector<40x32xf32>
    %cst_26 = arith.constant 4.471500e-02 : f32
    %51 = vector.broadcast %cst_26 : f32 to vector<40x32xf32>
    %52 = arith.mulf %51, %50 : vector<40x32xf32>
    %53 = arith.addf %48, %52 : vector<40x32xf32>
    %cst_27 = arith.constant 0.797884583 : f32
    %54 = vector.broadcast %cst_27 : f32 to vector<40x32xf32>
    %55 = arith.mulf %54, %53 : vector<40x32xf32>
    %56 = math.tanh %55 : vector<40x32xf32>
    %cst_28 = arith.constant 1.000000e+00 : f32
    %57 = vector.broadcast %cst_28 : f32 to vector<40x32xf32>
    %58 = arith.addf %57, %56 : vector<40x32xf32>
    %cst_29 = arith.constant 5.000000e-01 : f32
    %59 = vector.broadcast %cst_29 : f32 to vector<40x32xf32>
    %60 = arith.mulf %59, %58 : vector<40x32xf32>
    %61 = arith.mulf %48, %60 : vector<40x32xf32>
    %cst_30 = arith.constant dense<0.000000e+00> : vector<32xf32>
    %62 = vector.multi_reduction <add>, %61, %cst_30 [0] : vector<40x32xf32> to vector<32xf32>
    %63 = vector.shape_cast %62 : vector<32xf32> to vector<1x32xf32>
    %cst_31 = arith.constant 4.000000e+01 : f32
    %64 = vector.broadcast %cst_31 : f32 to vector<1x32xf32>
    %65 = arith.divf %63, %64 : vector<1x32xf32>
    %66 = vector.broadcast %65 : vector<1x32xf32> to vector<40x32xf32>
    %67 = arith.subf %61, %66 : vector<40x32xf32>
    %68 = arith.mulf %67, %67 : vector<40x32xf32>
    %cst_32 = arith.constant dense<0.000000e+00> : vector<32xf32>
    %69 = vector.multi_reduction <add>, %68, %cst_32 [0] : vector<40x32xf32> to vector<32xf32>
    %70 = vector.shape_cast %69 : vector<32xf32> to vector<1x32xf32>
    %cst_33 = arith.constant 4.000000e+01 : f32
    %71 = vector.broadcast %cst_33 : f32 to vector<1x32xf32>
    %72 = arith.divf %70, %71 : vector<1x32xf32>
    %cst_34 = arith.constant 9.99999974E-6 : f32
    %73 = vector.broadcast %cst_34 : f32 to vector<1x32xf32>
    %74 = arith.addf %72, %73 : vector<1x32xf32>
    %75 = math.rsqrt %74 : vector<1x32xf32>
    %76 = vector.broadcast %75 : vector<1x32xf32> to vector<40x32xf32>
    %77 = arith.mulf %67, %76 : vector<40x32xf32>
    %78 = vector.broadcast %7 : vector<40x1xf32> to vector<40x32xf32>
    %79 = arith.mulf %77, %78 : vector<40x32xf32>
    %80 = vector.broadcast %9 : vector<40x1xf32> to vector<40x32xf32>
    %81 = arith.addf %79, %80 : vector<40x32xf32>
    %82 = tpu.transpose %81, [1, 0] : vector<40x32xf32> -> vector<32x40xf32>
    %c0_35 = arith.constant 0 : index
    %c0_36 = arith.constant 0 : index
    %83 = vector.load %arg4[%c0_35, %c0_36] : memref<32x40xf32, #tpu.memory_space<vmem>>, vector<32x40xf32>
    tpu.vector_store %arg4[%c0_35, %c0_36], %82 {strides = array<i32>} : memref<32x40xf32, #tpu.memory_space<vmem>>, vector<32x40xf32>,
    return
  }
  func.func @transform_0(%arg0: i32) -> (i32, i32) {
    %c0_i32 = arith.constant 0 : i32
    %c0_i32_0 = arith.constant 0 : i32
    return %arg0, %c0_i32 : i32, i32
  }
  func.func @transform_1(%arg0: i32) -> (i32, i32, i32) {
    %c0_i32 = arith.constant 0 : i32
    %c0_i32_0 = arith.constant 0 : i32
    %c0_i32_1 = arith.constant 0 : i32
    %c0_i32_2 = arith.constant 0 : i32
    return %c0_i32, %c0_i32_0, %c0_i32_1 : i32, i32, i32
  }
  func.func @transform_2(%arg0: i32) -> (i32, i32, i32) {
    %c0_i32 = arith.constant 0 : i32
    %c0_i32_0 = arith.constant 0 : i32
    %c0_i32_1 = arith.constant 0 : i32
    %c0_i32_2 = arith.constant 0 : i32
    return %c0_i32, %c0_i32_0, %c0_i32_1 : i32, i32, i32
  }
  func.func @transform_3(%arg0: i32) -> (i32, i32) {
    %c0_i32 = arith.constant 0 : i32
    %c0_i32_0 = arith.constant 0 : i32
    return %arg0, %c0_i32 : i32, i32
  }
}

</mosaic_0001>

<bundles_post_ra>
// kernel: tpu_custom_call.1
= control target key start
LH: loop header
LB: loop body
LE: loop exit
PB: predicated region body
PF: predicated region fallthrough
CT: control target
= control target key end

     0   :  { %s1529_s0 = inlined_call_operand.vmem [shape: f32[32,40], index: 0, kind: input, shape index: {}]   ;;  %s1530_s1 = inlined_call_operand.vmem [shape: f32[4,40,1], index: 1, kind: input, shape index: {}]   ;;  %s1531_s2 = inlined_call_operand.vmem [shape: f32[2,40,40], index: 2, kind: input, shape index: {}]   ;;  %s1532_s3 = inlined_call_operand.hbm [shape: f32[32,40], index: 3, kind: output, shape index: {}]  }
   0x1   :  { %v15_v0 = vld [vmem:[%s1529_s0] sm:$0xff] }
   0x2   :  { %19 = vxpose.xlu0.b32.start [1/4] (short) (narrow) %v15_v0, 40 }
   0x3   :  { %8 = vsyncpa [#allocation3], 0  ;;  %v16_v1 = vld [vmem:[%s1529_s0 + $0x8] sm:$0xff]  ;;  %v17_v2 = vld [vmem:[%s1529_s0 + $0x10] sm:$0xff]  ;;  %v1219_v7 = vmov 40.0   ;;  %vm85_vm0 = vcmask 261120  }
   0x4   :  { %v18_v3 = vld [vmem:[%s1529_s0 + $0x18] sm:$0xff]  ;;  %1167 = vrcp.f32 %v1219_v7  ;;  %v1220_v59 = vmov 0   ;;  %v55_v60 = vld [vmem:[%s1530_s1 + $0x20] sm:$0xff]  ;;  %vm176_vm2 = vcmask 326656   ;;  %s1126_s25 = sshll.u32 %s1532_s3, 4  ;;  %s1222_s26 = smov 128   ;;  %s1127_s25 = int_to_ptr.hbm [resolvable:$true] %s1126_s25 }
   0x5   :  { %1164 = vset.pattern.permute.xlu1 %v1220_v59  ;;  %1165 = vset.pattern.permute.xlu2 %v1220_v59  ;;  %v74_v61 = vld [vmem:[%s1531_s2] sm:$0xff]  ;;  %s1223_s27 = smov 8  }
   0x6   :  { %173 = vperm.xlu1 %1164, %v55_v60   ;;  %v178_v0 = vsel %vm176_vm2, %v74_v61, 0  ;;  %v78_v61 = vld [vmem:[%s1531_s2 + $0x20] sm:$0xff] }
   0xa   :  { %20 = vxpose.xlu0.b32.cont [2/4] (short) (narrow) %v16_v1, 40  ;;  %v1168_v10 = vpop.eup %1167 }
   0xb   :  { %v102_v15 = vmul.f32 40.0, %v1168_v10  ;;  %vm106_vm1 = vweird.f32 %v1168_v10 }
   0xd   :  { %v103_v19 = vsub.f32 1.0, %v102_v15 }
   0xf   :  { %v104_v23 = vmul.f32 %v1168_v10, %v103_v19 }
  0x11   :  { %v105_v26 = vadd.f32 %v1168_v10, %v104_v23 }
  0x12   :  { %21 = vxpose.xlu0.b32.cont [3/4] (short) (narrow) %v17_v2, 40  ;;  %v54_v2 = vld [vmem:[%s1530_s1 + $0x18] sm:$0xff] }
  0x13   :  { %v1261_v29 = vsel %vm106_vm1, %v1168_v10, %v105_v26  ;;  %168 = vperm.xlu1 %1164, %v54_v2   ;;  %v51_v10 = vld [vmem:[%s1530_s1] sm:$0xff]  ;;  %v1148_v2 = vld [vmem:[%s1530_s1 + $0x78] sm:$0xff] }
  0x1a   :  { %22 = vxpose.xlu0.b32.end [4/4] (short) (narrow) %v18_v3, 40 }
  0x1b   :  { %153 = vperm.xlu1 %1164, %v51_v10   ;;  %v1149_v10 = vld [vmem:[%s1530_s1 + $0x80] sm:$0xff] }
  0x81   :  { %1166 = vset.pattern.permute.xlu0 %v1220_v59 }
  0xa6   :  { %v35_v4 = vpop.trf.xlu0 }
  0xa7   :  { %v86_v11 = vsel %vm85_vm0, %v35_v4, 0.0 }
  0xae   :  { %v36_v5 = vpop.trf.xlu0 }
  0xaf   :  { %v87_v9 = vsel %vm85_vm0, %v36_v5, 0.0 }
  0xb0   :  { %v88_v13 = vadd.f32 %v87_v9, %v86_v11 }
  0xb6   :  { %v37_v6 = vpop.trf.xlu0 }
  0xb7   :  { %v89_v12 = vsel %vm85_vm0, %v37_v6, 0.0 }
  0xb8   :  { %v90_v16 = vadd.f32 %v89_v12, %v88_v13 }
  0xbe   :  { %v38_v8 = vpop.trf.xlu0 }
  0xbf   :  { %v91_v14 = vsel %vm85_vm0, %v38_v8, 0.0 }
  0xc0   :  { %v92_v17 = vadd.f32 %v91_v14, %v90_v16 }
  0xc6   :  { %v39_v18 = vpop.trf.xlu0 }
  0xc7   :  { %v93_v20 = vsel %vm85_vm0, %v39_v18, 0.0 }
  0xc8   :  { %v94_v21 = vadd.f32 %v93_v20, %v92_v17 }
  0xca   :  { %v95_v22 = vrot.slane %v94_v21, 4 }
  0xcc   :  { %v96_v24 = vadd.f32 %v95_v22, %v94_v21 }
  0xce   :  { %v97_v25 = vrot.slane %v96_v24, 2 }
  0xd0   :  { %v98_v27 = vadd.f32 %v97_v25, %v96_v24 }
  0xd2   :  { %v99_v28 = vrot.slane %v98_v27, 1 }
  0xd4   :  { %v100_v30 = vadd.f32 %v99_v28, %v98_v27  ;;  %v76_v27 = vld [vmem:[%s1531_s2 + $0x10] sm:$0xff] }
  0xd6   :  { %v108_v31 = vmul.f32 %v1261_v29, %v100_v30 }
  0xd8   :  { %v109_v32 = vsub.f32 %v35_v4, %v108_v31  ;;  %v110_v33 = vsub.f32 %v36_v5, %v108_v31  ;;  %v111_v34 = vsub.f32 %v37_v6, %v108_v31  ;;  %v112_v35 = vsub.f32 %v38_v8, %v108_v31  ;;  %v75_v6 = vld [vmem:[%s1531_s2 + $0x8] sm:$0xff] }
  0xd9   :  { %v113_v36 = vsub.f32 %v39_v18, %v108_v31  ;;  %v1280_v4 = vand.u32 4294901760, %v178_v0  ;;  %v181_v9 = vsel %vm176_vm2, %v75_v6, 0 }
  0xda   :  { %v114_v37 = vmul.f32 %v109_v32, %v109_v32  ;;  %v115_v38 = vmul.f32 %v110_v33, %v110_v33  ;;  %v116_v39 = vmul.f32 %v111_v34, %v111_v34  ;;  %v117_v40 = vmul.f32 %v112_v35, %v112_v35 }
  0xdb   :  { %v118_v44 = vmul.f32 %v113_v36, %v113_v36  ;;  %v1286_v8 = vsub.f32 %v178_v0, %v1280_v4  ;;  %v1293_v18 = vand.u32 4294901760, %v181_v9 }
  0xdc   :  { %v119_v41 = vsel %vm85_vm0, %v114_v37, 0.0  ;;  %v120_v42 = vsel %vm85_vm0, %v115_v38, 0.0  ;;  %v122_v45 = vsel %vm85_vm0, %v116_v39, 0.0  ;;  %v124_v47 = vsel %vm85_vm0, %v117_v40, 0.0  ;;  %v1139_v37 = vld [vmem:[%s1530_s1 + $0x30] sm:$0xff] }
  0xdd   :  { %v121_v43 = vadd.f32 %v120_v42, %v119_v41  ;;  %v126_v49 = vsel %vm85_vm0, %v118_v44, 0.0  ;;  %v215_v17 = vand.u32 4294901760, %v1286_v8  ;;  %v1316_v31 = vsub.f32 %v181_v9, %v1293_v18  ;;  %566 = vperm.xlu1 %1164, %v1139_v37  }
  0xdf   :  { %v123_v46 = vadd.f32 %v122_v45, %v121_v43  ;;  %v216_v30 = vsub.f32 %v1286_v8, %v215_v17  ;;  %v223_v42 = vand.u32 4294901760, %v1316_v31 }
  0xe1   :  { %v125_v48 = vadd.f32 %v124_v47, %v123_v46  ;;  %v217_v41 = vand.u32 4294901760, %v216_v30 }
  0xe3   :  { %v127_v50 = vadd.f32 %v126_v49, %v125_v48  ;;  %v77_v49 = vld [vmem:[%s1531_s2 + $0x18] sm:$0xff] }
  0xe5   :  { %v128_v51 = vrot.slane %v127_v50, 4 }
  0xe7   :  { %v129_v52 = vadd.f32 %v128_v51, %v127_v50 }
  0xe9   :  { %v130_v53 = vrot.slane %v129_v52, 2 }
  0xeb   :  { %v131_v54 = vadd.f32 %v130_v53, %v129_v52  ;;  %v224_v52 = vsub.f32 %v1316_v31, %v223_v42 }
  0xed   :  { %v132_v55 = vrot.slane %v131_v54, 1 }
  0xef   :  { %v133_v56 = vadd.f32 %v132_v55, %v131_v54  ;;  %v187_v54 = vsel %vm176_vm2, %v77_v49, 0  ;;  %v1142_v55 = vld [vmem:[%s1530_s1 + $0x48] sm:$0xff] }
  0xf0   :  { %v1344_v60 = vand.u32 4294901760, %v187_v54  ;;  %581 = vperm.xlu1 %1164, %v1142_v55  }
  0xf1   :  { %v134_v57 = vmul.f32 %v133_v56, %v1261_v29 }
  0xf2   :  { %v238_v0 = vsub.f32 %v187_v54, %v1344_v60 }
  0xf3   :  { %v135_v58 = vadd.f32 1e-05, %v134_v57 }
  0xf5   :  { %1169 = vrsqrt.f32 %v135_v58  ;;  %vm142_vm4 = vweird.f32 %v135_v58 }
  0xf8   :  { %1056 = vperm.xlu1 %1164, %v1148_v2  }
  0xfb   :  { %v1170_v62 = vpop.eup %1169 }
  0xfc   :  { %v137_v63 = vmul.f32 %v1170_v62, %v135_v58  ;;  %vm143_vm3 = vweird.f32 %v1170_v62  ;;  %v225_v58 = vand.u32 4294901760, %v224_v52 }
  0xfd   :  { %vm144_vm5 = vmor %vm142_vm4, %vm143_vm3 }
  0xfe   :  { %v138_v1 = vmul.f32 %v1170_v62, %v137_v63 }
 0x100   :  { %v139_v3 = vmul.f32 0.5, %v138_v1  ;;  %v190_v1 = vsel %vm176_vm2, %v78_v61, 0  ;;  %1061 = vperm.xlu1 %1164, %v1149_v10  }
 0x101   :  { %v245_v6 = vand.u32 4294901760, %v190_v1 }
 0x102   :  { %v140_v5 = vsub.f32 1.5, %v139_v3 }
 0x103   :  { %v246_v9 = vsub.f32 %v190_v1, %v245_v6 }
 0x104   :  { %v141_v7 = vmul.f32 %v1170_v62, %v140_v5  ;;  %v239_v5 = vand.u32 4294901760, %v238_v0 }
 0x106   :  { %v145_v11 = vsel %vm144_vm5, %v1170_v62, %v141_v7  ;;  %v53_v62 = vld [vmem:[%s1530_s1 + $0x10] sm:$0xff]  ;;  %v52_v7 = vld [vmem:[%s1530_s1 + $0x8] sm:$0xff] }
 0x107   :  { %v150_v12 = vmul.f32 %v145_v11, %v113_v36  ;;  %v149_v13 = vmul.f32 %v145_v11, %v112_v35  ;;  %v148_v14 = vmul.f32 %v145_v11, %v111_v34  ;;  %v147_v15 = vmul.f32 %v145_v11, %v110_v33  ;;  %163 = vperm.xlu2 %1165, %v53_v62  }
 0x108   :  { %v146_v16 = vmul.f32 %v145_v11, %v109_v32  ;;  %v184_v36 = vsel %vm176_vm2, %v76_v27, 0 }
 0x109   :  { %v1295_v19 = vand.u32 4294901760, %v150_v12  ;;  %v1297_v20 = vand.u32 4294901760, %v149_v13  ;;  %v1299_v21 = vand.u32 4294901760, %v148_v14  ;;  %v1301_v22 = vand.u32 4294901760, %v147_v15 }
 0x10a   :  { %v1303_v23 = vand.u32 4294901760, %v146_v16  ;;  %v1329_v46 = vand.u32 4294901760, %v184_v36 }
 0x10b   :  { %204 = vmatpush.msra.mxu0 %v1295_v19  ;;  %380 = vmatpush.msra.mxu3 %v1295_v19  ;;  %v266_v24 = vsub.f32 %v150_v12, %v1295_v19  ;;  %v272_v25 = vsub.f32 %v149_v13, %v1297_v20  ;;  %v278_v26 = vsub.f32 %v148_v14, %v1299_v21  ;;  %v247_v12 = vand.u32 4294901760, %v246_v9  ;;  %v1138_v13 = vld [vmem:[%s1530_s1 + $0x28] sm:$0xff] }
 0x10c   :  { %v284_v28 = vsub.f32 %v147_v15, %v1301_v22  ;;  %v290_v34 = vsub.f32 %v146_v16, %v1303_v23  ;;  %v230_v53 = vsub.f32 %v184_v36, %v1329_v46  ;;  %v1150_v15 = vld [vmem:[%s1530_s1 + $0x88] sm:$0xff] }
 0x10d   :  { %206 = vmatpush.msra.mxu0 %v1297_v20  ;;  %329 = vmatpush.msra.mxu2 %v266_v24  ;;  %v267_v32 = vand.u32 4294901760, %v266_v24  ;;  %v273_v33 = vand.u32 4294901760, %v272_v25  ;;  %v279_v35 = vand.u32 4294901760, %v278_v26  ;;  %v248_v14 = vsub.f32 %v246_v9, %v247_v12 }
 0x10e   :  { %382 = vmatpush.msra.mxu3 %v1297_v20  ;;  %v285_v40 = vand.u32 4294901760, %v284_v28  ;;  %v291_v45 = vand.u32 4294901760, %v290_v34  ;;  %v231_v59 = vand.u32 4294901760, %v230_v53  ;;  %1066 = vperm.xlu1 %1164, %v1150_v15  }
 0x10f   :  { %208 = vmatpush.msra.mxu0 %v1299_v21  ;;  %332 = vmatpush.msra.mxu2 %v272_v25  ;;  %v268_v38 = vsub.f32 %v266_v24, %v267_v32  ;;  %v274_v39 = vsub.f32 %v272_v25, %v273_v33  ;;  %v280_v44 = vsub.f32 %v278_v26, %v279_v35  ;;  %v249_v16 = vand.u32 4294901760, %v248_v14  ;;  %v1147_v24 = vld [vmem:[%s1530_s1 + $0x70] sm:$0xff] }
 0x110   :  { %384 = vmatpush.msra.mxu3 %v1299_v21  ;;  %v286_v48 = vsub.f32 %v284_v28, %v285_v40  ;;  %v292_v51 = vsub.f32 %v290_v34, %v291_v45  ;;  %v232_v63 = vsub.f32 %v230_v53, %v231_v59  ;;  %158 = vperm.xlu2 %1165, %v52_v7  }
 0x111   :  { %210 = vmatpush.msra.mxu0 %v1301_v22  ;;  %335 = vmatpush.msra.mxu2 %v278_v26  ;;  %v269_v43 = vand.u32 4294901760, %v268_v38  ;;  %v275_v47 = vand.u32 4294901760, %v274_v39  ;;  %v281_v50 = vand.u32 4294901760, %v280_v44 }
 0x112   :  { %386 = vmatpush.msra.mxu3 %v1301_v22  ;;  %v287_v56 = vand.u32 4294901760, %v286_v48  ;;  %v293_v57 = vand.u32 4294901760, %v292_v51  ;;  %v233_v3 = vand.u32 4294901760, %v232_v63 }
 0x113   :  { %212 = vmatpush.msra.mxu0 %v1303_v23  ;;  %270 = vmatpush.msra.mxu1 %v269_v43 }
 0x114   :  { %338 = vmatpush.msra.mxu2 %v284_v28  ;;  %388 = vmatpush.msra.mxu3 %v1303_v23 }
 0x115   :  { %218 = vmatmul.f32.vlgmr.msra.gmra.mxu0 %v217_v41  ;;  %276 = vmatpush.msra.mxu1 %v275_v47 }
 0x116   :  { %434 = vmatpush.msrb.mxu0 %v267_v32  ;;  %341 = vmatpush.msra.mxu2 %v290_v34 }
 0x117   :  { %282 = vmatpush.msra.mxu1 %v281_v50  ;;  %344 = vmatmul.f32.vlgmr.msra.gmra.mxu2 %v1286_v8  ;;  %v240_v8 = vsub.f32 %v238_v0, %v239_v5 }
 0x118   :  { %438 = vmatpush.msrb.mxu0 %v273_v33  ;;  %392 = vmatmul.f32.vlgmr.msra.gmra.mxu3 %v215_v17  ;;  %v1140_v17 = vld [vmem:[%s1530_s1 + $0x38] sm:$0xff] }
 0x119   :  { %288 = vmatpush.msra.mxu1 %v287_v56  ;;  %v241_v11 = vand.u32 4294901760, %v240_v8  ;;  %561 = vperm.xlu2 %1165, %v1138_v13  }
 0x11a   :  { %442 = vmatpush.msrb.mxu0 %v279_v35 }
 0x11b   :  { %294 = vmatpush.msra.mxu1 %v293_v57 }
 0x11c   :  { %446 = vmatpush.msrb.mxu0 %v285_v40  ;;  %296 = vmatmul.f32.vlgmr.msra.gmra.mxu1 %v1280_v4 }
 0x11d   :  { %226 = vmatmul.f32.gmra.mxu0 %v225_v58  ;;  %484 = vmatpush.msrb.mxu1 %v1295_v19  ;;  %v1151_v19 = vld [vmem:[%s1530_s1 + $0x90] sm:$0xff] }
 0x11e   :  { %450 = vmatpush.msrb.mxu0 %v291_v45  ;;  %1071 = vperm.xlu1 %1164, %v1151_v19  }
 0x11f   :  { %486 = vmatpush.msrb.mxu1 %v1297_v20  ;;  %349 = vmatmul.f32.gmra.mxu2 %v1316_v31  ;;  %v1143_v20 = vld [vmem:[%s1530_s1 + $0x50] sm:$0xff] }
 0x120   :  { %398 = vmatmul.f32.gmra.mxu3 %v223_v42 }
 0x121   :  { %488 = vmatpush.msrb.mxu1 %v1299_v21  ;;  %571 = vperm.xlu2 %1165, %v1140_v17   ;;  %v1152_v21 = vld [vmem:[%s1530_s1 + $0x98] sm:$0xff] }
 0x123   :  { %490 = vmatpush.msrb.mxu1 %v1301_v22  ;;  %v1144_v22 = vld [vmem:[%s1530_s1 + $0x58] sm:$0xff] }
 0x124   :  { %300 = vmatmul.f32.gmra.mxu1 %v1293_v18 }
 0x125   :  { %234 = vmatmul.f32.gmra.mxu0 %v233_v3  ;;  %492 = vmatpush.msrb.mxu1 %v1303_v23  ;;  %v1145_v23 = vld [vmem:[%s1530_s1 + $0x60] sm:$0xff] }
 0x126   :  { %1076 = vperm.xlu1 %1164, %v1152_v21  }
 0x127   :  { %354 = vmatmul.f32.gmra.mxu2 %v230_v53 }
 0x128   :  { %404 = vmatmul.f32.gmra.mxu3 %v231_v59 }
 0x129   :  { %1026 = vperm.xlu2 %1165, %v1143_v20  }
 0x12c   :  { %304 = vmatmul.f32.gmra.mxu1 %v1329_v46 }
 0x12d   :  { %242 = vmatmul.f32.gmra.mxu0 %v241_v11 }
 0x12f   :  { %359 = vmatmul.f32.gmra.mxu2 %v238_v0 }
 0x130   :  { %410 = vmatmul.f32.gmra.mxu3 %v239_v5 }
 0x131   :  { %1031 = vperm.xlu2 %1165, %v1144_v22  }
 0x134   :  { %308 = vmatmul.f32.gmra.mxu1 %v1344_v60 }
 0x135   :  { %250 = vmatmul.f32.gmra.mxu0 %v249_v16 }
 0x137   :  { %364 = vmatmul.f32.gmra.mxu2 %v246_v9 }
 0x138   :  { %416 = vmatmul.f32.gmra.mxu3 %v247_v12 }
 0x139   :  { %1036 = vperm.xlu2 %1165, %v1145_v23  }
 0x13c   :  { %312 = vmatmul.f32.gmra.mxu1 %v245_v6 }
 0x13d   :  { %452 = vmatmul.f32.vlgmr.msrb.gmra.mxu0 %v1280_v4 }
 0x144   :  { %494 = vmatmul.f32.vlgmr.msrb.gmra.mxu1 %v1280_v4  ;;  %v1146_v4 = vld [vmem:[%s1530_s1 + $0x68] sm:$0xff] }
 0x145   :  { %456 = vmatmul.f32.gmra.mxu0 %v1293_v18  ;;  %1041 = vperm.xlu2 %1165, %v1146_v4  }
 0x14c   :  { %498 = vmatmul.f32.gmra.mxu1 %v1293_v18  ;;  %v174_v18 = vpop.permute.xlu1 %173 }
 0x14d   :  { %460 = vmatmul.f32.gmra.mxu0 %v1329_v46  ;;  %1046 = vperm.xlu2 %1165, %v1147_v24  }
 0x154   :  { %502 = vmatmul.f32.gmra.mxu1 %v1329_v46  ;;  %v169_v25 = vpop.permute.xlu1 %168 }
 0x155   :  { %464 = vmatmul.f32.gmra.mxu0 %v1344_v60 }
 0x15c   :  { %506 = vmatmul.f32.gmra.mxu1 %v1344_v60  ;;  %v154_v27 = vpop.permute.xlu1 %153 }
 0x15d   :  { %468 = vmatmul.f32.gmra.mxu0 %v245_v6 }
 0x161   :  { %v164_v38 = vpop.permute.xlu2 %163 }
 0x164   :  { %510 = vmatmul.f32.gmra.mxu1 %v245_v6 }
 0x16a   :  { %v159_v45 = vpop.permute.xlu2 %158 }
 0x192   :  { %v219_v26 = vpop.f32.mrf.mxu0 }
 0x193   :  { %v220_v28 = vadd.f32 %v219_v26, %v154_v27 }
 0x199   :  { %v297_v30 = vpop.f32.mrf.mxu1 }
 0x19a   :  { %v227_v31 = vpop.f32.mrf.mxu0  ;;  %v298_v32 = vadd.f32 %v297_v30, %v220_v28  ;;  %v345_v37 = vpop.f32.mrf.mxu2 }
 0x19b   :  { %v393_v41 = vpop.f32.mrf.mxu3  ;;  %v228_v46 = vadd.f32 %v227_v31, %v159_v45 }
 0x19c   :  { %v346_v54 = vadd.f32 %v345_v37, %v298_v32 }
 0x19e   :  { %v394_v58 = vadd.f32 %v393_v41, %v346_v54 }
 0x1a1   :  { %v301_v33 = vpop.f32.mrf.mxu1 }
 0x1a2   :  { %v235_v34 = vpop.f32.mrf.mxu0  ;;  %v350_v42 = vpop.f32.mrf.mxu2  ;;  %v302_v48 = vadd.f32 %v301_v33, %v228_v46 }
 0x1a3   :  { %v399_v47 = vpop.f32.mrf.mxu3  ;;  %v236_v50 = vadd.f32 %v235_v34, %v164_v38 }
 0x1a4   :  { %v351_v53 = vadd.f32 %v350_v42, %v302_v48 }
 0x1a6   :  { %v400_v57 = vadd.f32 %v399_v47, %v351_v53 }
 0x1a9   :  { %v305_v35 = vpop.f32.mrf.mxu1 }
 0x1aa   :  { %v243_v36 = vpop.f32.mrf.mxu0  ;;  %v355_v52 = vpop.f32.mrf.mxu2  ;;  %v306_v55 = vadd.f32 %v305_v35, %v236_v50 }
 0x1ab   :  { %v405_v56 = vpop.f32.mrf.mxu3  ;;  %v244_v60 = vadd.f32 %v243_v36, %v169_v25 }
 0x1ac   :  { %v356_v61 = vadd.f32 %v355_v52, %v306_v55 }
 0x1ae   :  { %v406_v5 = vadd.f32 %v405_v56, %v356_v61 }
 0x1b1   :  { %v309_v39 = vpop.f32.mrf.mxu1 }
 0x1b2   :  { %v251_v40 = vpop.f32.mrf.mxu0  ;;  %v360_v2 = vpop.f32.mrf.mxu2  ;;  %v310_v6 = vadd.f32 %v309_v39, %v244_v60 }
 0x1b3   :  { %v411_v9 = vpop.f32.mrf.mxu3  ;;  %v252_v12 = vadd.f32 %v251_v40, %v174_v18 }
 0x1b4   :  { %v361_v13 = vadd.f32 %v360_v2, %v310_v6 }
 0x1b6   :  { %v412_v20 = vadd.f32 %v411_v9, %v361_v13 }
 0x1b9   :  { %v313_v43 = vpop.f32.mrf.mxu1 }
 0x1ba   :  { %v453_v44 = vpop.f32.mrf.mxu0  ;;  %v314_v21 = vadd.f32 %v313_v43, %v252_v12  ;;  %v365_v23 = vpop.f32.mrf.mxu2  ;;  %v1154_v12 = vld [vmem:[%s1531_s2 + $0x30] sm:$0xff] }
 0x1bb   :  { %v454_v0 = vadd.f32 %v453_v44, %v394_v58  ;;  %v417_v31 = vpop.f32.mrf.mxu3 }
 0x1bc   :  { %v366_v28 = vadd.f32 %v365_v23, %v314_v21 }
 0x1be   :  { %v418_v36 = vadd.f32 %v417_v31, %v366_v28 }
 0x1c1   :  { %v495_v49 = vpop.f32.mrf.mxu1 }
 0x1c2   :  { %v457_v51 = vpop.f32.mrf.mxu0  ;;  %v1413_v3 = vadd.f32 %v495_v49, %v454_v0 }
 0x1c3   :  { %v458_v62 = vadd.f32 %v457_v51, %v400_v57  ;;  %v1153_v57 = vld [vmem:[%s1531_s2 + $0x28] sm:$0xff] }
 0x1c4   :  { %v514_v10 = vmul.f32 %v1413_v3, %v1413_v3 }
 0x1c6   :  { %v519_v19 = vmul.f32 %v514_v10, %v1413_v3 }
 0x1c8   :  { %v524_v26 = vmul.f32 0.044715, %v519_v19  ;;  %v588_v19 = vsel %vm176_vm2, %v1154_v12, 0 }
 0x1c9   :  { %v499_v59 = vpop.f32.mrf.mxu1 }
 0x1ca   :  { %v461_v63 = vpop.f32.mrf.mxu0  ;;  %v1411_v1 = vadd.f32 %v499_v59, %v458_v62  ;;  %v529_v34 = vadd.f32 %v524_v26, %v1413_v3 }
 0x1cb   :  { %v462_v7 = vadd.f32 %v461_v63, %v406_v5  ;;  %v585_v63 = vsel %vm176_vm2, %v1153_v57, 0 }
 0x1cc   :  { %v515_v8 = vmul.f32 %v1411_v1, %v1411_v1  ;;  %v534_v42 = vmul.f32 0.7978846, %v529_v34  ;;  %v1427_v6 = vand.u32 4294901760, %v585_v63 }
 0x1ce   :  { %v520_v16 = vmul.f32 %v515_v8, %v1411_v1 }
 0x1d0   :  { %v525_v4 = vmul.f32 0.044715, %v520_v16 }
 0x1d1   :  { %v503_v11 = vpop.f32.mrf.mxu1 }
 0x1d2   :  { %v504_v14 = vadd.f32 %v503_v11, %v462_v7  ;;  %v465_v15 = vpop.f32.mrf.mxu0  ;;  %v530_v32 = vadd.f32 %v525_v4, %v1411_v1 }
 0x1d3   :  { %v466_v24 = vadd.f32 %v465_v15, %v412_v20  ;;  %v621_v15 = vsub.f32 %v585_v63, %v1427_v6  ;;  %v1141_v63 = vld [vmem:[%s1530_s1 + $0x40] sm:$0xff]  ;;  %s1221_s1 = smov [#allocation2]  }
 0x1d4   :  { %v516_v17 = vmul.f32 %v504_v14, %v504_v14  ;;  %v535_v39 = vmul.f32 0.7978846, %v530_v32  ;;  %576 = vperm.xlu0 %1166, %v1141_v63   ;;  %s1124_s22 = sshll.u32 %s1221_s1, 4  ;;  %s1125_s22 = int_to_ptr.vmem [resolvable:$true] %s1124_s22 }
 0x1d6   :  { %v521_v22 = vmul.f32 %v516_v17, %v504_v14 }
 0x1d8   :  { %v526_v25 = vmul.f32 0.044715, %v521_v22  ;;  %v622_v22 = vand.u32 4294901760, %v621_v15 }
 0x1d9   :  { %v507_v27 = vpop.f32.mrf.mxu1 }
 0x1da   :  { %v531_v30 = vadd.f32 %v526_v25, %v504_v14  ;;  %v508_v18 = vadd.f32 %v507_v27, %v466_v24  ;;  %v469_v35 = vpop.f32.mrf.mxu0  ;;  %v1155_v27 = vld [vmem:[%s1531_s2 + $0x38] sm:$0xff]  ;;  %v623_v28 = vsub.f32 %v621_v15, %v622_v22 }
 0x1db   :  { %v470_v40 = vadd.f32 %v469_v35, %v418_v36 }
 0x1dc   :  { %v517_v33 = vmul.f32 %v508_v18, %v508_v18  ;;  %v536_v37 = vmul.f32 0.7978846, %v531_v30 }
 0x1de   :  { %v522_v38 = vmul.f32 %v517_v33, %v508_v18  ;;  %1171 = vtanh.f32 %v536_v37  ;;  %v591_v33 = vsel %vm176_vm2, %v1155_v27, 0  ;;  %v624_v37 = vand.u32 4294901760, %v623_v28 }
 0x1df   :  { %1173 = vtanh.f32 %v535_v39 }
 0x1e0   :  { %v527_v41 = vmul.f32 0.044715, %v522_v38  ;;  %1175 = vtanh.f32 %v534_v42  ;;  %v1465_v42 = vand.u32 4294901760, %v591_v33 }
 0x1e1   :  { %v511_v43 = vpop.f32.mrf.mxu1 }
 0x1e2   :  { %v532_v44 = vadd.f32 %v527_v41, %v508_v18  ;;  %v512_v45 = vadd.f32 %v511_v43, %v470_v40 }
 0x1e4   :  { %v537_v46 = vmul.f32 0.7978846, %v532_v44  ;;  %v518_v47 = vmul.f32 %v512_v45, %v512_v45  ;;  %v1172_v49 = vpop.eup %1171 }
 0x1e5   :  { %v1174_v51 = vpop.eup %1173  ;;  %v546_v54 = vadd.f32 1.0, %v1172_v49  ;;  %v637_v49 = vsub.f32 %v591_v33, %v1465_v42 }
 0x1e6   :  { %1177 = vtanh.f32 %v537_v46  ;;  %v523_v48 = vmul.f32 %v518_v47, %v512_v45  ;;  %v1176_v53 = vpop.eup %1175  ;;  %v545_v58 = vadd.f32 1.0, %v1174_v51 }
 0x1e7   :  { %v544_v60 = vadd.f32 1.0, %v1176_v53  ;;  %v551_v61 = vmul.f32 0.5, %v546_v54  ;;  %v638_v54 = vand.u32 4294901760, %v637_v49 }
 0x1e8   :  { %v528_v50 = vmul.f32 0.044715, %v523_v48  ;;  %v550_v0 = vmul.f32 0.5, %v545_v58 }
 0x1e9   :  { %v549_v5 = vmul.f32 0.5, %v544_v60  ;;  %v556_v7 = vmul.f32 %v551_v61, %v504_v14  ;;  %v639_v57 = vsub.f32 %v637_v49, %v638_v54 }
 0x1ea   :  { %v533_v52 = vadd.f32 %v528_v50, %v512_v45  ;;  %v555_v9 = vmul.f32 %v550_v0, %v1411_v1 }
 0x1eb   :  { %v554_v13 = vmul.f32 %v549_v5, %v1413_v3  ;;  %v1437_v17 = vand.u32 4294901760, %v556_v7  ;;  %v1448_v3 = vand.u32 4294901760, %v588_v19  ;;  %v640_v60 = vand.u32 4294901760, %v639_v57 }
 0x1ec   :  { %v1178_v55 = vpop.eup %1177  ;;  %v538_v56 = vmul.f32 0.7978846, %v533_v52  ;;  %v1441_v1 = vand.u32 4294901760, %v555_v9 }
 0x1ed   :  { %v547_v59 = vadd.f32 1.0, %v1178_v55  ;;  %v1443_v21 = vand.u32 4294901760, %v554_v13  ;;  %v685_v4 = vsub.f32 %v556_v7, %v1437_v17  ;;  %v629_v32 = vsub.f32 %v588_v19, %v1448_v3 }
 0x1ee   :  { %1179 = vtanh.f32 %v538_v56  ;;  %v691_v25 = vsub.f32 %v555_v9, %v1441_v1  ;;  %v1157_v56 = vld [vmem:[%s1531_s2 + $0x48] sm:$0xff] }
 0x1ef   :  { %v552_v62 = vmul.f32 0.5, %v547_v59  ;;  %v697_v30 = vsub.f32 %v554_v13, %v1443_v21  ;;  %v686_v31 = vand.u32 4294901760, %v685_v4  ;;  %v630_v41 = vand.u32 4294901760, %v629_v32 }
 0x1f0   :  { %v692_v36 = vand.u32 4294901760, %v691_v25  ;;  %v597_v59 = vsel %vm176_vm2, %v1157_v56, 0 }
 0x1f1   :  { %v557_v2 = vmul.f32 %v552_v62, %v508_v18  ;;  %v698_v38 = vand.u32 4294901760, %v697_v30  ;;  %v687_v40 = vsub.f32 %v685_v4, %v686_v31  ;;  %v631_v48 = vsub.f32 %v629_v32, %v630_v41 }
 0x1f2   :  { %v693_v44 = vsub.f32 %v691_v25, %v692_v36  ;;  %v652_v62 = vand.u32 4294901760, %v597_v59 }
 0x1f3   :  { %v1430_v11 = vand.u32 4294901760, %v557_v2  ;;  %v688_v46 = vand.u32 4294901760, %v687_v40  ;;  %v699_v47 = vsub.f32 %v697_v30, %v698_v38  ;;  %v632_v53 = vand.u32 4294901760, %v631_v48 }
 0x1f4   :  { %v1180_v8 = vpop.eup %1179  ;;  %v694_v51 = vand.u32 4294901760, %v693_v44 }
 0x1f5   :  { %v548_v10 = vadd.f32 1.0, %v1180_v8  ;;  %v679_v20 = vsub.f32 %v557_v2, %v1430_v11  ;;  %v700_v52 = vand.u32 4294901760, %v699_v47  ;;  %v653_v2 = vsub.f32 %v597_v59, %v652_v62 }
 0x1f7   :  { %v553_v16 = vmul.f32 0.5, %v548_v10  ;;  %v680_v26 = vand.u32 4294901760, %v679_v20  ;;  %v654_v7 = vand.u32 4294901760, %v653_v2 }
 0x1f9   :  { %v558_v14 = vmul.f32 %v553_v16, %v512_v45  ;;  %v681_v35 = vsub.f32 %v679_v20, %v680_v26  ;;  %v1156_v45 = vld [vmem:[%s1531_s2 + $0x40] sm:$0xff]  ;;  %v655_v8 = vsub.f32 %v653_v2, %v654_v7 }
 0x1fa   :  { %v594_v50 = vsel %vm176_vm2, %v1156_v45, 0 }
 0x1fb   :  { %v1445_v23 = vand.u32 4294901760, %v558_v14  ;;  %v682_v43 = vand.u32 4294901760, %v681_v35  ;;  %v644_v55 = vand.u32 4294901760, %v594_v50  ;;  %v656_v9 = vand.u32 4294901760, %v655_v8 }
 0x1fd   :  { %611 = vmatpush.msrb.mxu2 %v1445_v23  ;;  %787 = vmatpush.msra.mxu1 %v1445_v23  ;;  %v673_v24 = vsub.f32 %v558_v14, %v1445_v23  ;;  %v645_v58 = vsub.f32 %v594_v50, %v644_v55 }
 0x1ff   :  { %613 = vmatpush.msrb.mxu2 %v1430_v11  ;;  %736 = vmatpush.msra.mxu0 %v673_v24  ;;  %v674_v18 = vand.u32 4294901760, %v673_v24  ;;  %v646_v61 = vand.u32 4294901760, %v645_v58 }
 0x200   :  { %789 = vmatpush.msra.mxu1 %v1430_v11 }
 0x201   :  { %615 = vmatpush.msrb.mxu2 %v1437_v17  ;;  %739 = vmatpush.msra.mxu0 %v679_v20  ;;  %v675_v34 = vsub.f32 %v673_v24, %v674_v18  ;;  %v647_v0 = vsub.f32 %v645_v58, %v646_v61 }
 0x202   :  { %791 = vmatpush.msra.mxu1 %v1437_v17 }
 0x203   :  { %617 = vmatpush.msrb.mxu2 %v1441_v1  ;;  %742 = vmatpush.msra.mxu0 %v685_v4  ;;  %v676_v39 = vand.u32 4294901760, %v675_v34  ;;  %v648_v5 = vand.u32 4294901760, %v647_v0 }
 0x204   :  { %793 = vmatpush.msra.mxu1 %v1441_v1 }
 0x205   :  { %619 = vmatpush.msrb.mxu2 %v1443_v21  ;;  %677 = vmatpush.msrb.mxu3 %v676_v39 }
 0x206   :  { %745 = vmatpush.msra.mxu0 %v691_v25  ;;  %795 = vmatpush.msra.mxu1 %v1443_v21 }
 0x207   :  { %625 = vmatmul.f32.vlgmr.msrb.gmra.mxu2 %v624_v37  ;;  %683 = vmatpush.msrb.mxu3 %v682_v43 }
 0x208   :  { %841 = vmatpush.msra.mxu2 %v674_v18  ;;  %748 = vmatpush.msra.mxu0 %v697_v30 }
 0x209   :  { %689 = vmatpush.msrb.mxu3 %v688_v46  ;;  %751 = vmatmul.f32.vlgmr.msra.gmra.mxu0 %v621_v15 }
 0x20a   :  { %845 = vmatpush.msra.mxu2 %v680_v26  ;;  %799 = vmatmul.f32.vlgmr.msra.gmra.mxu1 %v622_v22 }
 0x20b   :  { %695 = vmatpush.msrb.mxu3 %v694_v51 }
 0x20c   :  { %849 = vmatpush.msra.mxu2 %v686_v31 }
 0x20d   :  { %701 = vmatpush.msrb.mxu3 %v700_v52 }
 0x20e   :  { %853 = vmatpush.msra.mxu2 %v692_v36  ;;  %703 = vmatmul.f32.vlgmr.msrb.gmra.mxu3 %v1427_v6 }
 0x20f   :  { %633 = vmatmul.f32.gmra.mxu2 %v632_v53  ;;  %891 = vmatpush.msra.mxu3 %v1445_v23 }
 0x210   :  { %857 = vmatpush.msra.mxu2 %v698_v38 }
 0x211   :  { %893 = vmatpush.msra.mxu3 %v1430_v11  ;;  %756 = vmatmul.f32.gmra.mxu0 %v629_v32 }
 0x212   :  { %805 = vmatmul.f32.gmra.mxu1 %v630_v41 }
 0x213   :  { %895 = vmatpush.msra.mxu3 %v1437_v17 }
 0x215   :  { %897 = vmatpush.msra.mxu3 %v1441_v1  ;;  %v562_v1 = vpop.permute.xlu2 %561 }
 0x216   :  { %707 = vmatmul.f32.gmra.mxu3 %v1448_v3 }
 0x217   :  { %641 = vmatmul.f32.gmra.mxu2 %v640_v60  ;;  %899 = vmatpush.msra.mxu3 %v1443_v21 }
 0x219   :  { %761 = vmatmul.f32.gmra.mxu0 %v637_v49 }
 0x21a   :  { %811 = vmatmul.f32.gmra.mxu1 %v638_v54 }
 0x21d   :  { %v572_v32 = vpop.permute.xlu2 %571 }
 0x21e   :  { %711 = vmatmul.f32.gmra.mxu3 %v1465_v42 }
 0x21f   :  { %649 = vmatmul.f32.gmra.mxu2 %v648_v5 }
 0x221   :  { %766 = vmatmul.f32.gmra.mxu0 %v645_v58 }
 0x222   :  { %817 = vmatmul.f32.gmra.mxu1 %v646_v61 }
 0x226   :  { %715 = vmatmul.f32.gmra.mxu3 %v644_v55 }
 0x227   :  { %657 = vmatmul.f32.gmra.mxu2 %v656_v9 }
 0x229   :  { %771 = vmatmul.f32.gmra.mxu0 %v653_v2 }
 0x22a   :  { %823 = vmatmul.f32.gmra.mxu1 %v654_v7 }
 0x22e   :  { %719 = vmatmul.f32.gmra.mxu3 %v652_v62 }
 0x22f   :  { %859 = vmatmul.f32.vlgmr.msra.gmra.mxu2 %v1427_v6 }
 0x236   :  { %901 = vmatmul.f32.vlgmr.msra.gmra.mxu3 %v1427_v6 }
 0x237   :  { %863 = vmatmul.f32.gmra.mxu2 %v1448_v3 }
 0x23e   :  { %905 = vmatmul.f32.gmra.mxu3 %v1448_v3  ;;  %v567_v3 = vpop.permute.xlu1 %566 }
 0x23f   :  { %867 = vmatmul.f32.gmra.mxu2 %v1465_v42 }
 0x246   :  { %909 = vmatmul.f32.gmra.mxu3 %v1465_v42  ;;  %v577_v41 = vpop.permute.xlu0 %576  ;;  %v582_v61 = vpop.permute.xlu1 %581 }
 0x247   :  { %871 = vmatmul.f32.gmra.mxu2 %v644_v55 }
 0x24e   :  { %913 = vmatmul.f32.gmra.mxu3 %v644_v55 }
 0x24f   :  { %875 = vmatmul.f32.gmra.mxu2 %v652_v62 }
 0x256   :  { %917 = vmatmul.f32.gmra.mxu3 %v652_v62 }
 0x286   :  { %v752_v6 = vpop.f32.mrf.mxu0 }
 0x287   :  { %v800_v20 = vpop.f32.mrf.mxu1 }
 0x28a   :  { %v626_v10 = vpop.f32.mrf.mxu2 }
 0x28b   :  { %v627_v21 = vadd.f32 %v626_v10, %v562_v1 }
 0x28e   :  { %v757_v22 = vpop.f32.mrf.mxu0 }
 0x28f   :  { %v806_v26 = vpop.f32.mrf.mxu1 }
 0x291   :  { %v704_v11 = vpop.f32.mrf.mxu3 }
 0x292   :  { %v634_v12 = vpop.f32.mrf.mxu2  ;;  %v705_v24 = vadd.f32 %v704_v11, %v627_v21 }
 0x293   :  { %v635_v25 = vadd.f32 %v634_v12, %v567_v3 }
 0x294   :  { %v753_v28 = vadd.f32 %v752_v6, %v705_v24 }
 0x296   :  { %v801_v33 = vadd.f32 %v800_v20, %v753_v28  ;;  %v762_v34 = vpop.f32.mrf.mxu0 }
 0x297   :  { %v812_v39 = vpop.f32.mrf.mxu1 }
 0x299   :  { %v708_v13 = vpop.f32.mrf.mxu3 }
 0x29a   :  { %v642_v15 = vpop.f32.mrf.mxu2  ;;  %v709_v27 = vadd.f32 %v708_v13, %v635_v25 }
 0x29b   :  { %v643_v35 = vadd.f32 %v642_v15, %v572_v32 }
 0x29c   :  { %v758_v18 = vadd.f32 %v757_v22, %v709_v27 }
 0x29e   :  { %v807_v37 = vadd.f32 %v806_v26, %v758_v18  ;;  %v767_v50 = vpop.f32.mrf.mxu0 }
 0x29f   :  { %v818_v56 = vpop.f32.mrf.mxu1 }
 0x2a1   :  { %v712_v16 = vpop.f32.mrf.mxu3 }
 0x2a2   :  { %v650_v17 = vpop.f32.mrf.mxu2  ;;  %v713_v38 = vadd.f32 %v712_v16, %v643_v35 }
 0x2a3   :  { %v651_v47 = vadd.f32 %v650_v17, %v577_v41 }
 0x2a4   :  { %v763_v44 = vadd.f32 %v762_v34, %v713_v38 }
 0x2a6   :  { %v813_v51 = vadd.f32 %v812_v39, %v763_v44  ;;  %v772_v10 = vpop.f32.mrf.mxu0 }
 0x2a7   :  { %v824_v20 = vpop.f32.mrf.mxu1 }
 0x2a9   :  { %v716_v19 = vpop.f32.mrf.mxu3 }
 0x2aa   :  { %v658_v14 = vpop.f32.mrf.mxu2  ;;  %v717_v53 = vadd.f32 %v716_v19, %v651_v47 }
 0x2ab   :  { %v659_v0 = vadd.f32 %v658_v14, %v582_v61 }
 0x2ac   :  { %v768_v59 = vadd.f32 %v767_v50, %v717_v53 }
 0x2ae   :  { %v819_v8 = vadd.f32 %v818_v56, %v768_v59 }
 0x2b1   :  { %v720_v23 = vpop.f32.mrf.mxu3 }
 0x2b2   :  { %v860_v4 = vpop.f32.mrf.mxu2  ;;  %v721_v5 = vadd.f32 %v720_v23, %v659_v0 }
 0x2b3   :  { %v861_v36 = vadd.f32 %v860_v4, %v801_v33 }
 0x2b4   :  { %v773_v16 = vadd.f32 %v772_v10, %v721_v5 }
 0x2b6   :  { %v825_v23 = vadd.f32 %v824_v20, %v773_v16 }
 0x2b9   :  { %v902_v30 = vpop.f32.mrf.mxu3 }
 0x2ba   :  { %v864_v31 = vpop.f32.mrf.mxu2  ;;  %v1496_v40 = vadd.f32 %v902_v30, %v861_v36 }
 0x2bb   :  { %v865_v42 = vadd.f32 %v864_v31, %v807_v37 }
 0x2bc   :  { %v921_v48 = vmul.f32 %v1496_v40, %v1496_v40 }
 0x2be   :  { %v926_v54 = vmul.f32 %v921_v48, %v1496_v40 }
 0x2c0   :  { %v931_v62 = vmul.f32 0.044715, %v926_v54 }
 0x2c1   :  { %v906_v43 = vpop.f32.mrf.mxu3 }
 0x2c2   :  { %v868_v45 = vpop.f32.mrf.mxu2  ;;  %v1498_v46 = vadd.f32 %v906_v43, %v865_v42  ;;  %v936_v11 = vadd.f32 %v931_v62, %v1496_v40 }
 0x2c3   :  { %v869_v55 = vadd.f32 %v868_v45, %v813_v51 }
 0x2c4   :  { %v922_v49 = vmul.f32 %v1498_v46, %v1498_v46  ;;  %v941_v1 = vmul.f32 0.7978846, %v936_v11 }
 0x2c6   :  { %v927_v52 = vmul.f32 %v922_v49, %v1498_v46 }
 0x2c8   :  { %v932_v58 = vmul.f32 0.044715, %v927_v52 }
 0x2c9   :  { %v910_v57 = vpop.f32.mrf.mxu3 }
 0x2ca   :  { %v911_v60 = vadd.f32 %v910_v57, %v869_v55  ;;  %v872_v63 = vpop.f32.mrf.mxu2  ;;  %v937_v7 = vadd.f32 %v932_v58, %v1498_v46 }
 0x2cb   :  { %v873_v12 = vadd.f32 %v872_v63, %v819_v8 }
 0x2cc   :  { %v923_v2 = vmul.f32 %v911_v60, %v911_v60  ;;  %v942_v17 = vmul.f32 0.7978846, %v937_v7 }
 0x2ce   :  { %v928_v9 = vmul.f32 %v923_v2, %v911_v60  ;;  %1181 = vtanh.f32 %v942_v17 }
 0x2cf   :  { %1183 = vtanh.f32 %v941_v1 }
 0x2d0   :  { %v933_v13 = vmul.f32 0.044715, %v928_v9 }
 0x2d1   :  { %v914_v15 = vpop.f32.mrf.mxu3 }
 0x2d2   :  { %v938_v6 = vadd.f32 %v933_v13, %v911_v60  ;;  %v915_v19 = vadd.f32 %v914_v15, %v873_v12  ;;  %v876_v22 = vpop.f32.mrf.mxu2 }
 0x2d3   :  { %v877_v3 = vadd.f32 %v876_v22, %v825_v23 }
 0x2d4   :  { %v943_v21 = vmul.f32 0.7978846, %v938_v6  ;;  %v924_v14 = vmul.f32 %v915_v19, %v915_v19  ;;  %v1182_v28 = vpop.eup %1181 }
 0x2d5   :  { %v1184_v31 = vpop.eup %1183  ;;  %v952_v34 = vadd.f32 1.0, %v1182_v28 }
 0x2d6   :  { %v929_v4 = vmul.f32 %v924_v14, %v915_v19  ;;  %1185 = vtanh.f32 %v943_v21  ;;  %v951_v36 = vadd.f32 1.0, %v1184_v31 }
 0x2d7   :  { %v957_v39 = vmul.f32 0.5, %v952_v34 }
 0x2d8   :  { %v934_v24 = vmul.f32 0.044715, %v929_v4  ;;  %v956_v43 = vmul.f32 0.5, %v951_v36  ;;  %v1027_v36 = vpop.permute.xlu2 %1026 }
 0x2d9   :  { %v918_v25 = vpop.f32.mrf.mxu3  ;;  %v962_v47 = vmul.f32 %v957_v39, %v1498_v46  ;;  %v1057_v39 = vpop.permute.xlu1 %1056 }
 0x2da   :  { %v939_v26 = vadd.f32 %v934_v24, %v915_v19  ;;  %v919_v27 = vadd.f32 %v918_v25, %v877_v3  ;;  %v961_v49 = vmul.f32 %v956_v43, %v1496_v40 }
 0x2db   :  { %v967_v51 = vsel %vm85_vm0, %v962_v47, 0.0 }
 0x2dc   :  { %v944_v30 = vmul.f32 0.7978846, %v939_v26  ;;  %v925_v18 = vmul.f32 %v919_v27, %v919_v27  ;;  %v1186_v32 = vpop.eup %1185  ;;  %v966_v54 = vsel %vm85_vm0, %v961_v49, 0.0 }
 0x2dd   :  { %v953_v37 = vadd.f32 1.0, %v1186_v32  ;;  %v968_v57 = vadd.f32 %v967_v51, %v966_v54 }
 0x2de   :  { %1187 = vtanh.f32 %v944_v30  ;;  %v930_v33 = vmul.f32 %v925_v18, %v919_v27 }
 0x2df   :  { %v958_v44 = vmul.f32 0.5, %v953_v37 }
 0x2e0   :  { %v935_v35 = vmul.f32 0.044715, %v930_v33 }
 0x2e1   :  { %v963_v50 = vmul.f32 %v958_v44, %v911_v60 }
 0x2e2   :  { %v940_v38 = vadd.f32 %v935_v35, %v919_v27 }
 0x2e3   :  { %v969_v55 = vsel %vm85_vm0, %v963_v50, 0.0 }
 0x2e4   :  { %v1188_v41 = vpop.eup %1187  ;;  %v945_v42 = vmul.f32 0.7978846, %v940_v38  ;;  %v970_v61 = vadd.f32 %v969_v55, %v968_v57 }
 0x2e5   :  { %v954_v45 = vadd.f32 1.0, %v1188_v41 }
 0x2e6   :  { %1189 = vtanh.f32 %v945_v42 }
 0x2e7   :  { %v959_v48 = vmul.f32 0.5, %v954_v45  ;;  %v1032_v45 = vpop.permute.xlu2 %1031 }
 0x2e9   :  { %v964_v52 = vmul.f32 %v959_v48, %v915_v19 }
 0x2eb   :  { %v971_v58 = vsel %vm85_vm0, %v964_v52, 0.0 }
 0x2ec   :  { %v1190_v53 = vpop.eup %1189  ;;  %v972_v46 = vadd.f32 %v971_v58, %v970_v61 }
 0x2ed   :  { %v955_v56 = vadd.f32 1.0, %v1190_v53 }
 0x2ef   :  { %v960_v59 = vmul.f32 0.5, %v955_v56  ;;  %v1037_v51 = vpop.permute.xlu2 %1036 }
 0x2f1   :  { %v965_v62 = vmul.f32 %v960_v59, %v919_v27 }
 0x2f3   :  { %v973_v63 = vsel %vm85_vm0, %v965_v62, 0.0 }
 0x2f4   :  { %v974_v40 = vadd.f32 %v973_v63, %v972_v46 }
 0x2f6   :  { %v975_v60 = vrot.slane %v974_v40, 4 }
 0x2f7   :  { %v1042_v58 = vpop.permute.xlu2 %1041 }
 0x2f8   :  { %v976_v0 = vadd.f32 %v975_v60, %v974_v40 }
 0x2fa   :  { %v977_v2 = vrot.slane %v976_v0, 2 }
 0x2fc   :  { %v978_v5 = vadd.f32 %v977_v2, %v976_v0 }
 0x2fe   :  { %v979_v7 = vrot.slane %v978_v5, 1 }
 0x2ff   :  { %v1047_v63 = vpop.permute.xlu2 %1046 }
 0x300   :  { %v980_v8 = vadd.f32 %v979_v7, %v978_v5 }
 0x302   :  { %v981_v9 = vmul.f32 %v980_v8, %v1261_v29 }
 0x304   :  { %v982_v10 = vsub.f32 %v961_v49, %v981_v9  ;;  %v983_v11 = vsub.f32 %v962_v47, %v981_v9  ;;  %v984_v12 = vsub.f32 %v963_v50, %v981_v9  ;;  %v985_v13 = vsub.f32 %v964_v52, %v981_v9 }
 0x305   :  { %v986_v15 = vsub.f32 %v965_v62, %v981_v9 }
 0x306   :  { %v987_v16 = vmul.f32 %v982_v10, %v982_v10  ;;  %v988_v17 = vmul.f32 %v983_v11, %v983_v11  ;;  %v989_v6 = vmul.f32 %v984_v12, %v984_v12  ;;  %v990_v19 = vmul.f32 %v985_v13, %v985_v13 }
 0x307   :  { %v991_v14 = vmul.f32 %v986_v15, %v986_v15 }
 0x308   :  { %v992_v20 = vsel %vm85_vm0, %v987_v16, 0.0  ;;  %v993_v1 = vsel %vm85_vm0, %v988_v17, 0.0  ;;  %v995_v22 = vsel %vm85_vm0, %v989_v6, 0.0  ;;  %v997_v4 = vsel %vm85_vm0, %v990_v19, 0.0 }
 0x309   :  { %v994_v21 = vadd.f32 %v993_v1, %v992_v20  ;;  %v999_v24 = vsel %vm85_vm0, %v991_v14, 0.0 }
 0x30b   :  { %v996_v23 = vadd.f32 %v995_v22, %v994_v21 }
 0x30d   :  { %v998_v3 = vadd.f32 %v997_v4, %v996_v23 }
 0x30f   :  { %v1000_v25 = vadd.f32 %v999_v24, %v998_v3 }
 0x311   :  { %v1001_v26 = vrot.slane %v1000_v25, 4 }
 0x313   :  { %v1002_v27 = vadd.f32 %v1001_v26, %v1000_v25 }
 0x315   :  { %v1003_v28 = vrot.slane %v1002_v27, 2 }
 0x317   :  { %v1004_v30 = vadd.f32 %v1003_v28, %v1002_v27 }
 0x319   :  { %v1005_v18 = vrot.slane %v1004_v30, 1 }
 0x31b   :  { %v1006_v31 = vadd.f32 %v1005_v18, %v1004_v30 }
 0x31d   :  { %v1007_v32 = vmul.f32 %v1006_v31, %v1261_v29  ;;  %v1062_v29 = vpop.permute.xlu1 %1061 }
 0x31f   :  { %v1008_v33 = vadd.f32 1e-05, %v1007_v32 }
 0x321   :  { %1191 = vrsqrt.f32 %v1008_v33  ;;  %vm1015_vm7 = vweird.f32 %v1008_v33 }
 0x325   :  { %v1067_v54 = vpop.permute.xlu1 %1066 }
 0x327   :  { %v1192_v34 = vpop.eup %1191 }
 0x328   :  { %v1010_v35 = vmul.f32 %v1192_v34, %v1008_v33  ;;  %vm1016_vm6 = vweird.f32 %v1192_v34 }
 0x329   :  { %vm1017_vm8 = vmor %vm1015_vm7, %vm1016_vm6 }
 0x32a   :  { %v1011_v37 = vmul.f32 %v1192_v34, %v1010_v35 }
 0x32c   :  { %v1012_v38 = vmul.f32 0.5, %v1011_v37 }
 0x32d   :  { %v1072_v61 = vpop.permute.xlu1 %1071 }
 0x32e   :  { %v1013_v41 = vsub.f32 1.5, %v1012_v38 }
 0x330   :  { %v1014_v42 = vmul.f32 %v1192_v34, %v1013_v41 }
 0x332   :  { %v1018_v43 = vsel %vm1017_vm8, %v1192_v34, %v1014_v42 }
 0x333   :  { %v1019_v44 = vmul.f32 %v1018_v43, %v982_v10  ;;  %v1020_v49 = vmul.f32 %v1018_v43, %v983_v11  ;;  %v1021_v53 = vmul.f32 %v1018_v43, %v984_v12  ;;  %v1022_v57 = vmul.f32 %v1018_v43, %v985_v13 }
 0x334   :  { %v1023_v46 = vmul.f32 %v1018_v43, %v986_v15 }
 0x335   :  { %v1049_v47 = vmul.f32 %v1027_v36, %v1019_v44  ;;  %v1050_v50 = vmul.f32 %v1032_v45, %v1020_v49  ;;  %v1051_v55 = vmul.f32 %v1037_v51, %v1021_v53  ;;  %v1052_v59 = vmul.f32 %v1042_v58, %v1022_v57  ;;  %v1077_v60 = vpop.permute.xlu1 %1076 }
 0x336   :  { %v1053_v40 = vmul.f32 %v1047_v63, %v1023_v46 }
 0x337   :  { %v1079_v48 = vadd.f32 %v1057_v39, %v1049_v47  ;;  %v1080_v52 = vadd.f32 %v1062_v29, %v1050_v50  ;;  %v1081_v56 = vadd.f32 %v1067_v54, %v1051_v55  ;;  %v1082_v62 = vadd.f32 %v1072_v61, %v1052_v59 }
 0x338   :  { %v1083_v0 = vadd.f32 %v1077_v60, %v1053_v40 }
 0x339   :  { %1084 = vxpose.xlu2.b32.start [1/5] (short) (narrow) %v1079_v48, 32 }
 0x341   :  { %1085 = vxpose.xlu2.b32.cont [2/5] (short) (narrow) %v1080_v52, 32 }
 0x349   :  { %1086 = vxpose.xlu2.b32.cont [3/5] (short) (narrow) %v1081_v56, 32 }
 0x351   :  { %1087 = vxpose.xlu2.b32.cont [4/5] (short) (narrow) %v1082_v62, 32 }
 0x359   :  { %1088 = vxpose.xlu2.b32.end [5/5] (short) (narrow) %v1083_v0, 32 }
 0x3d2   :  { %v1100_v2 = vpop.trf.xlu2 }
 0x3d3   :  { %1116 = vst.msk [vmem:[#allocation2] sm:$0xff] %vm176_vm2, %v1100_v2 }
 0x3da   :  { %v1101_v5 = vpop.trf.xlu2 }
 0x3db   :  { %1117 = vst.msk [vmem:[#allocation2 + $0x8] sm:$0xff] %vm176_vm2, %v1101_v5 }
 0x3e2   :  { %v1102_v7 = vpop.trf.xlu2 }
 0x3e3   :  { %1118 = vst.msk [vmem:[#allocation2 + $0x10] sm:$0xff] %vm176_vm2, %v1102_v7 }
 0x3ea   :  { %v1103_v8 = vpop.trf.xlu2 }
 0x3eb   :  { %1119 = vst.msk [vmem:[#allocation2 + $0x18] sm:$0xff] %vm176_vm2, %v1103_v8 }
 0x3ec   :  { %1132 = dma.vmem_to_hbm [thread:$0]  %s1125_s22, 512, %s1127_s25, [#allocation3], %s1222_s26, %s1222_s26, %s1223_s27  }
 0x3ed   :  { %1217 = dma.done.wait [#allocation3], 512  }
 0x3ee   :  { %1218 = vsyncadd [#allocation3], 4294966784 }
 0x3ef   :  { %1137 = vsyncpa [#allocation3], 1 }

</bundles_post_ra>
